<compile_context>
chip_gen: v5e
topology: v5e:2x2
jax: 0.10.0
libtpu: 0.0.40
codegen_flags: <defaults>
</compile_context>

<pallas_src>
import functools

import jax
import jax.numpy as jnp
from jax import lax
from jax.experimental import pallas as pl
from jax.experimental.pallas import tpu as pltpu

BN_EPS = 1e-5
LANE = 128
STATS_LANES = 8          # lane 0 = partial sum, lane 1 = partial sum-of-squares, rest zero


def _round_up(x, m):
    return (x + m - 1) // m * m


def _vmem_capacity_bytes():
    # Generation-aware VMEM: 128 MiB on v5e/v6e, 64 MiB per TensorCore on v7x.
    try:
        return int(pltpu.get_tpu_info().vmem_capacity_bytes)
    except Exception:
        return 64 * 1024 * 1024      # conservative fallback (v7x-sized)


def _tiling(L_out, CK_pad, C_pad):
    """Pick the L-tile (lane) size and per-call VMEM budget for this generation."""
    vmem = _vmem_capacity_bytes()
    vmem_limit = int(min(100 * 1024 * 1024, (vmem * 3) // 4))
    # Double-buffered streams per lane: bf16 patch tile (both passes) + f32 output tile (pass 2).
    per_lane_bytes = 2 * (2 * CK_pad) + 2 * (4 * C_pad)
    # Resident (constant index_map) operands: bf16 weight (double-buffered) + scale/shift/stats.
    resident_bytes = 2 * (2 * CK_pad * C_pad) + 4 * (C_pad * STATS_LANES * 4)
    avail = max(vmem_limit - resident_bytes - (4 << 20), 1 << 20)
    fit = max(LANE, (avail // per_lane_bytes) // LANE * LANE)
    cap = 2048 if vmem >= (100 << 20) else 512    # big tiles on 128 MiB parts, safe on 64 MiB v7x
    tile_l = max(LANE, min(cap, fit, _round_up(L_out, LANE)))
    return tile_l, vmem_limit


# -------- Pass 1: conv tile on the MXU, emit per-tile partial batch statistics --------
def _conv_stats_kernel(patch_ref, w_ref, stats_ref):
    # (C_pad, CK_pad) @ (CK_pad, tile_l) -> (C_pad, tile_l); bf16 MXU inputs, f32 accumulation.
    conv = jnp.dot(w_ref[...], patch_ref[0], preferred_element_type=jnp.float32)
    # Padded lanes / padded CK rows are exactly zero -> contribute 0 to both partials (no mask).
    s = jnp.sum(conv, axis=1, keepdims=True)            # (C_pad, 1), cross-lane reduce (XLU)
    q = jnp.sum(conv * conv, axis=1, keepdims=True)
    lane = lax.broadcasted_iota(jnp.int32, (conv.shape[0], STATS_LANES), 1)
    stats_ref[0] = jnp.where(lane == 0, s, 0.0) + jnp.where(lane == 1, q, 0.0)


# -------- Pass 2: recompute conv, apply folded BN scale/shift + Swish, store NCL tile --------
def _conv_bn_swish_kernel(patch_ref, w_ref, scale_ref, shift_ref, o_ref):
    conv = jnp.dot(w_ref[...], patch_ref[0], preferred_element_type=jnp.float32)
    y = conv * scale_ref[:, 0:1] + shift_ref[:, 0:1]
    o_ref[0] = y * jax.nn.sigmoid(y)                     # sigmoid -> EUP slot (effectively free)


@functools.partial(jax.jit, static_argnums=(5,))
def conv_layer_forward(x, weight, bias, gamma, beta, stride):
    """x: (N, C_in, L) f32; weight: (C_out, C_in, K); bias/gamma/beta: (C_out,)."""
    # NOTE: `bias` is intentionally unused by the kernels — under training-mode BatchNorm the
    # conv bias cancels exactly: scale*((conv+b) - (mean_conv+b)) + beta == scale*(conv-mean_conv) + beta.
    del bias
    N, C_in, L = x.shape
    C_out, _, K = weight.shape
    L_out = (L - K) // stride + 1
    R = N * L_out
    CK = C_in * K

    C_pad = _round_up(C_out, LANE)
    CK_pad = _round_up(CK, LANE)
    tile_l, vmem_limit = _tiling(L_out, CK_pad, C_pad)
    L_pad = _round_up(L_out, tile_l)
    n_l_tiles = L_pad // tile_l

    # im2col in transposed layout, bf16, zero-pad fused:
    #   patches[n, c*K + k, l] = x[n, c, l*stride + k]
    # (casting x to bf16 BEFORE the gather halves the gather bytes; no f32 (R, CK) intermediate.)
    x_bf = x.astype(jnp.bfloat16)
    idx = jnp.arange(K)[:, None] + jnp.arange(L_out)[None, :] * stride        # (K, L_out)
    patches = x_bf[:, :, idx].reshape(N, CK, L_out)                           # contiguous, no transpose
    patches_p = jnp.zeros((N, CK_pad, L_pad), jnp.bfloat16)
    patches_p = patches_p.at[:, :CK, :L_out].set(patches)

    # Weight as (C_out, C_in*K): conv = W @ patches yields channel-major (NCL) tiles directly.
    w_p = jnp.zeros((C_pad, CK_pad), jnp.bfloat16)
    w_p = w_p.at[:C_out, :CK].set(weight.reshape(C_out, CK).astype(jnp.bfloat16))

    compiler_params = pltpu.CompilerParams(
        dimension_semantics=("parallel", "parallel"),   # per-tile outputs -> both TCs on v7x
        vmem_limit_bytes=vmem_limit,
    )

    # ---- Pass 1: per-tile partial statistics (no conv intermediate ever hits HBM). ----
    stats = pl.pallas_call(
        _conv_stats_kernel,
        out_shape=jax.ShapeDtypeStruct((N * n_l_tiles, C_pad, STATS_LANES), jnp.float32),
        grid=(N, n_l_tiles),
        in_specs=[
            pl.BlockSpec((1, CK_pad, tile_l), lambda n, lt: (n, 0, lt)),
            pl.BlockSpec((C_pad, CK_pad), lambda n, lt: (0, 0)),
        ],
        out_specs=pl.BlockSpec((1, C_pad, STATS_LANES),
                               lambda n, lt: (n * n_l_tiles + lt, 0, 0)),
        compiler_params=compiler_params,
    )(patches_p, w_p)

    # Finalize BN on tiny per-channel vectors; fold gamma/beta/mean/var into one scale + shift.
    s = jnp.sum(stats[:, :C_out, 0], axis=0)
    q = jnp.sum(stats[:, :C_out, 1], axis=0)
    mean = s / R
    var = jnp.maximum(q / R - mean * mean, 0.0)          # biased variance (PyTorch normalization)
    scale = gamma * lax.rsqrt(var + BN_EPS)
    shift = beta - mean * scale                          # conv bias cancelled (see note above)
    scale_p = jnp.zeros((C_pad, STATS_LANES), jnp.float32).at[:C_out, 0].set(scale)
    shift_p = jnp.zeros((C_pad, STATS_LANES), jnp.float32).at[:C_out, 0].set(shift)

    # ---- Pass 2: recompute conv (MXU has slack in this HBM-bound kernel; cheaper than an f32
    #      round-trip), apply scale/shift + Swish, store natively in (N, C, L) layout. ----
    out_p = pl.pallas_call(
        _conv_bn_swish_kernel,
        out_shape=jax.ShapeDtypeStruct((N, C_pad, L_pad), jnp.float32),
        grid=(N, n_l_tiles),
        in_specs=[
            pl.BlockSpec((1, CK_pad, tile_l), lambda n, lt: (n, 0, lt)),
            pl.BlockSpec((C_pad, CK_pad), lambda n, lt: (0, 0)),
            pl.BlockSpec((C_pad, STATS_LANES), lambda n, lt: (0, 0)),
            pl.BlockSpec((C_pad, STATS_LANES), lambda n, lt: (0, 0)),
        ],
        out_specs=pl.BlockSpec((1, C_pad, tile_l), lambda n, lt: (n, 0, lt)),
        compiler_params=compiler_params,
    )(patches_p, w_p, scale_p, shift_p)

    # Only a slice remains (no transpose / reshape pass): (N, C_pad, L_pad) -> (N, C_out, L_out).
    return out_p[:, :C_out, :L_out]


def conv_layer_reference(x, weight, bias, gamma, beta, stride):
    """Pure-JAX f32 reference of the PyTorch forward (training-mode BN, bias included)."""
    conv = lax.conv_general_dilated(
        x, weight, window_strides=(stride,), padding="VALID",
        dimension_numbers=("NCH", "OIH", "NCH"))
    conv = conv + bias[None, :, None]
    mean = jnp.mean(conv, axis=(0, 2), keepdims=True)
    var = jnp.mean((conv - mean) ** 2, axis=(0, 2), keepdims=True)
    xhat = (conv - mean) * lax.rsqrt(var + BN_EPS)
    y = xhat * gamma[None, :, None] + beta[None, :, None]
    return y * jax.nn.sigmoid(y)


if __name__ == "__main__":
    # Small shapes consistent with the module: batch=2, in_channels=4, length=16,
    # out_channels=8, kernel_size=3, stride=2  ->  L_out = 7
    N, C_in, L = 2, 4, 16
    C_out, K, stride = 8, 3, 2

    key = jax.random.PRNGKey(0)
    kx, kw, kb = jax.random.split(key, 3)

    x = jax.random.normal(kx, (N, C_in, L), dtype=jnp.float32)

    # PyTorch Conv1d default init: U(-sqrt(k), sqrt(k)), k = 1/(C_in*K)
    bound = (1.0 / (C_in * K)) ** 0.5
    weight = jax.random.uniform(kw, (C_out, C_in, K), jnp.float32, -bound, bound)
    bias = jax.random.uniform(kb, (C_out,), jnp.float32, -bound, bound)
    gamma = jnp.ones((C_out,), jnp.float32)   # BatchNorm1d default weight
    beta = jnp.zeros((C_out,), jnp.float32)   # BatchNorm1d default bias

    out = conv_layer_forward(x, weight, bias, gamma, beta, stride)
    out = jax.block_until_ready(out)

    ref = conv_layer_reference(x, weight, bias, gamma, beta, stride)
    assert out.shape == (N, C_out, (L - K) // stride + 1)
    # bf16 MXU inputs (f32 accumulation + f32 BN/Swish) -> loosened tolerance vs f32's 1e-5.
    assert jnp.allclose(out, ref, atol=3e-2, rtol=3e-2), "mismatch vs reference"

    print("KERNEL_OK")
</pallas_src>

<mosaic_0001>
module attributes {stable_mosaic.version = 11 : i64} {
  func.func @_conv_stats_kernel(%arg0: i32, %arg1: i32, %arg2: memref<1x128x128xbf16, #tpu.memory_space<vmem>>, %arg3: memref<128x128xbf16, #tpu.memory_space<vmem>>, %arg4: memref<1x128x8xf32, #tpu.memory_space<vmem>>) attributes {dimension_semantics = [#tpu.dimension_semantics<parallel>, #tpu.dimension_semantics<parallel>], iteration_bounds = array<i64: 2, 1>, scalar_prefetch = 0 : i64, scratch_operands = 0 : i64, tpu.core_type = #tpu.core_type<tc>, window_params = [{transform_indices = @transform_0, window_bounds = array<i64: 1, 128, 128>}, {pipeline_mode = #tpu.pipeline_mode<synchronous>, transform_indices = @transform_1, window_bounds = array<i64: 128, 128>}, {transform_indices = @transform_2, window_bounds = array<i64: 1, 128, 8>}]} {
    %c0 = arith.constant 0 : index
    %c0_0 = arith.constant 0 : index
    %0 = vector.load %arg3[%c0, %c0_0] : memref<128x128xbf16, #tpu.memory_space<vmem>>, vector<128x128xbf16>
    %c0_1 = arith.constant 0 : index
    %c0_2 = arith.constant 0 : index
    %c0_3 = arith.constant 0 : index
    %1 = vector.load %arg2[%c0_1, %c0_2, %c0_3] : memref<1x128x128xbf16, #tpu.memory_space<vmem>>, vector<1x128x128xbf16>
    %2 = vector.shape_cast %1 : vector<1x128x128xbf16> to vector<128x128xbf16>
    %cst = arith.constant dense<0.000000e+00> : vector<128x128xf32>
    %3 = tpu.matmul %0, %2, %cst {dimension_numbers = #tpu.dot_dimension_numbers<[1], [0], [0], [1], [0, 0, 1, 1], [], []>} : vector<128x128xbf16>, vector<128x128xbf16>, vector<128x128xf32> -> vector<128x128xf32>
    %cst_4 = arith.constant dense<0.000000e+00> : vector<128xf32>
    %4 = vector.multi_reduction <add>, %3, %cst_4 [1] : vector<128x128xf32> to vector<128xf32>
    %5 = vector.shape_cast %4 : vector<128xf32> to vector<128x1xf32>
    %6 = arith.mulf %3, %3 : vector<128x128xf32>
    %cst_5 = arith.constant dense<0.000000e+00> : vector<128xf32>
    %7 = vector.multi_reduction <add>, %6, %cst_5 [1] : vector<128x128xf32> to vector<128xf32>
    %8 = vector.shape_cast %7 : vector<128xf32> to vector<128x1xf32>
    %9 = tpu.iota {dimensions = array<i32: 1>} : vector<128x8xi32>
    %c0_i32 = arith.constant 0 : i32
    %10 = vector.broadcast %c0_i32 : i32 to vector<128x8xi32>
    %11 = arith.cmpi eq, %9, %10 : vector<128x8xi32>
    %cst_6 = arith.constant 0.000000e+00 : f32
    %12 = vector.shape_cast %5 : vector<128x1xf32> to vector<128x1xf32>
    %13 = vector.broadcast %12 : vector<128x1xf32> to vector<128x8xf32>
    %14 = vector.broadcast %cst_6 : f32 to vector<128x8xf32>
    %15 = arith.select %11, %13, %14 : vector<128x8xi1>, vector<128x8xf32>
    %c1_i32 = arith.constant 1 : i32
    %16 = vector.broadcast %c1_i32 : i32 to vector<128x8xi32>
    %17 = arith.cmpi eq, %9, %16 : vector<128x8xi32>
    %cst_7 = arith.constant 0.000000e+00 : f32
    %18 = vector.shape_cast %8 : vector<128x1xf32> to vector<128x1xf32>
    %19 = vector.broadcast %18 : vector<128x1xf32> to vector<128x8xf32>
    %20 = vector.broadcast %cst_7 : f32 to vector<128x8xf32>
    %21 = arith.select %17, %19, %20 : vector<128x8xi1>, vector<128x8xf32>
    %22 = arith.addf %15, %21 : vector<128x8xf32>
    %c0_8 = arith.constant 0 : index
    %c0_9 = arith.constant 0 : index
    %c0_10 = arith.constant 0 : index
    %23 = vector.load %arg4[%c0_8, %c0_9, %c0_10] : memref<1x128x8xf32, #tpu.memory_space<vmem>>, vector<1x128x8xf32>
    %24 = vector.shape_cast %23 : vector<1x128x8xf32> to vector<128x8xf32>
    %25 = vector.shape_cast %22 : vector<128x8xf32> to vector<1x128x8xf32>
    tpu.vector_store %arg4[%c0_8, %c0_9, %c0_10], %25 {strides = array<i32>} : memref<1x128x8xf32, #tpu.memory_space<vmem>>, vector<1x128x8xf32>,
    return
  }
  func.func @transform_0(%arg0: i32, %arg1: i32) -> (i32, i32, i32) {
    %c0_i32 = arith.constant 0 : i32
    %c0_i32_0 = arith.constant 0 : i32
    return %arg0, %c0_i32, %arg1 : i32, i32, i32
  }
  func.func @transform_1(%arg0: i32, %arg1: i32) -> (i32, i32) {
    %c0_i32 = arith.constant 0 : i32
    %c0_i32_0 = arith.constant 0 : i32
    %c0_i32_1 = arith.constant 0 : i32
    return %c0_i32, %c0_i32_0 : i32, i32
  }
  func.func @transform_2(%arg0: i32, %arg1: i32) -> (i32, i32, i32) {
    %c1_i32 = arith.constant 1 : i32
    %0 = arith.muli %arg0, %c1_i32 : i32
    %1 = arith.addi %0, %arg1 : i32
    %c0_i32 = arith.constant 0 : i32
    %c0_i32_0 = arith.constant 0 : i32
    %c0_i32_1 = arith.constant 0 : i32
    return %1, %c0_i32, %c0_i32_0 : i32, i32, i32
  }
}

module attributes {stable_mosaic.version = 11 : i64} {
  func.func @_conv_bn_swish_kernel(%arg0: i32, %arg1: i32, %arg2: memref<1x128x128xbf16, #tpu.memory_space<vmem>>, %arg3: memref<128x128xbf16, #tpu.memory_space<vmem>>, %arg4: memref<128x8xf32, #tpu.memory_space<vmem>>, %arg5: memref<128x8xf32, #tpu.memory_space<vmem>>, %arg6: memref<1x128x128xf32, #tpu.memory_space<vmem>>) attributes {dimension_semantics = [#tpu.dimension_semantics<parallel>, #tpu.dimension_semantics<parallel>], iteration_bounds = array<i64: 2, 1>, scalar_prefetch = 0 : i64, scratch_operands = 0 : i64, tpu.core_type = #tpu.core_type<tc>, window_params = [{transform_indices = @transform_0, window_bounds = array<i64: 1, 128, 128>}, {pipeline_mode = #tpu.pipeline_mode<synchronous>, transform_indices = @transform_1, window_bounds = array<i64: 128, 128>}, {pipeline_mode = #tpu.pipeline_mode<synchronous>, transform_indices = @transform_2, window_bounds = array<i64: 128, 8>}, {pipeline_mode = #tpu.pipeline_mode<synchronous>, transform_indices = @transform_3, window_bounds = array<i64: 128, 8>}, {transform_indices = @transform_4, window_bounds = array<i64: 1, 128, 128>}]} {
    %c0 = arith.constant 0 : index
    %c0_0 = arith.constant 0 : index
    %0 = vector.load %arg3[%c0, %c0_0] : memref<128x128xbf16, #tpu.memory_space<vmem>>, vector<128x128xbf16>
    %c0_1 = arith.constant 0 : index
    %c0_2 = arith.constant 0 : index
    %c0_3 = arith.constant 0 : index
    %1 = vector.load %arg2[%c0_1, %c0_2, %c0_3] : memref<1x128x128xbf16, #tpu.memory_space<vmem>>, vector<1x128x128xbf16>
    %2 = vector.shape_cast %1 : vector<1x128x128xbf16> to vector<128x128xbf16>
    %cst = arith.constant dense<0.000000e+00> : vector<128x128xf32>
    %3 = tpu.matmul %0, %2, %cst {dimension_numbers = #tpu.dot_dimension_numbers<[1], [0], [0], [1], [0, 0, 1, 1], [], []>} : vector<128x128xbf16>, vector<128x128xbf16>, vector<128x128xf32> -> vector<128x128xf32>
    %c0_4 = arith.constant 0 : index
    %c0_5 = arith.constant 0 : index
    %4 = vector.load %arg4[%c0_4, %c0_5] : memref<128x8xf32, #tpu.memory_space<vmem>>, vector<128x1xf32>
    %5 = vector.broadcast %4 : vector<128x1xf32> to vector<128x128xf32>
    %6 = arith.mulf %3, %5 : vector<128x128xf32>
    %c0_6 = arith.constant 0 : index
    %c0_7 = arith.constant 0 : index
    %7 = vector.load %arg5[%c0_6, %c0_7] : memref<128x8xf32, #tpu.memory_space<vmem>>, vector<128x1xf32>
    %8 = vector.broadcast %7 : vector<128x1xf32> to vector<128x128xf32>
    %9 = arith.addf %6, %8 : vector<128x128xf32>
    %10 = arith.negf %9 : vector<128x128xf32>
    %11 = math.exp %10 : vector<128x128xf32>
    %cst_8 = arith.constant 1.000000e+00 : f32
    %12 = vector.broadcast %cst_8 : f32 to vector<128x128xf32>
    %13 = arith.addf %12, %11 : vector<128x128xf32>
    %14 = arith.divf %12, %13 : vector<128x128xf32>
    %15 = arith.mulf %9, %14 : vector<128x128xf32>
    %c0_9 = arith.constant 0 : index
    %c0_10 = arith.constant 0 : index
    %c0_11 = arith.constant 0 : index
    %16 = vector.load %arg6[%c0_9, %c0_10, %c0_11] : memref<1x128x128xf32, #tpu.memory_space<vmem>>, vector<1x128x128xf32>
    %17 = vector.shape_cast %16 : vector<1x128x128xf32> to vector<128x128xf32>
    %18 = vector.shape_cast %15 : vector<128x128xf32> to vector<1x128x128xf32>
    tpu.vector_store %arg6[%c0_9, %c0_10, %c0_11], %18 {strides = array<i32>} : memref<1x128x128xf32, #tpu.memory_space<vmem>>, vector<1x128x128xf32>,
    return
  }
  func.func @transform_0(%arg0: i32, %arg1: i32) -> (i32, i32, i32) {
    %c0_i32 = arith.constant 0 : i32
    %c0_i32_0 = arith.constant 0 : i32
    return %arg0, %c0_i32, %arg1 : i32, i32, i32
  }
  func.func @transform_1(%arg0: i32, %arg1: i32) -> (i32, i32) {
    %c0_i32 = arith.constant 0 : i32
    %c0_i32_0 = arith.constant 0 : i32
    %c0_i32_1 = arith.constant 0 : i32
    return %c0_i32, %c0_i32_0 : i32, i32
  }
  func.func @transform_2(%arg0: i32, %arg1: i32) -> (i32, i32) {
    %c0_i32 = arith.constant 0 : i32
    %c0_i32_0 = arith.constant 0 : i32
    %c0_i32_1 = arith.constant 0 : i32
    return %c0_i32, %c0_i32_0 : i32, i32
  }
  func.func @transform_3(%arg0: i32, %arg1: i32) -> (i32, i32) {
    %c0_i32 = arith.constant 0 : i32
    %c0_i32_0 = arith.constant 0 : i32
    %c0_i32_1 = arith.constant 0 : i32
    return %c0_i32, %c0_i32_0 : i32, i32
  }
  func.func @transform_4(%arg0: i32, %arg1: i32) -> (i32, i32, i32) {
    %c0_i32 = arith.constant 0 : i32
    %c0_i32_0 = arith.constant 0 : i32
    return %arg0, %c0_i32, %arg1 : i32, i32, i32
  }
}

</mosaic_0001>

<bundles_post_ra>
// kernel: conv_layer_forward.2
= control target key start
LH: loop header
LB: loop body
LE: loop exit
PB: predicated region body
PF: predicated region fallthrough
CT: control target
= control target key end

     0   :  { %s751_s9 = smov 0   ;;  %s753_s10 = smov 0   ;;  %s924_s0 = inlined_call_operand.vmem [shape: bf16[2,128,128], index: 0, kind: input, shape index: {}]   ;;  %s925_s1 = inlined_call_operand.vmem [shape: bf16[128,128], index: 1, kind: input, shape index: {}]   ;;  %s926_s2 = inlined_call_operand.vmem [shape: f32[2,128,8], index: 2, kind: output, shape index: {}]  }
   0x1   :  { %s755_s11 = smov 0  }
   0x2 LB: > { %s24_s12 = sadd.s32 1, %s730_s10  ;;  %p575_p0 = scmp.ge.s32.totalorder %s734_s11, 1  ;;  %s734_s11 = sphi %s755_s11, %s12_s11   ;;  %s730_s10 = sphi %s753_s10, %s928_s10   ;;  %s726_s9 = sphi %s751_s9, %s927_s9  }
   0x3   : > { %p26_p1 = scmp.ge.s32.totalorder %s24_s12, 2  ;;  %p131_p2 = scmp.lt.s32.totalorder %s734_s11, 3 }
   0x5   : > { %s930_s12 = smov (%p26_p1, %s24_s12), 0  ;;  %p132_p3 = pnand %p575_p0, %p131_p2 }
   0x6   : > { %p157_p4 = scmp.lt.s32.totalorder (!%p132_p3), %s726_s9, 1 }
   0x7   : > { %135 = sbr.rel (%p132_p3) target bundleno = 375 (0x177), region = 28 }
   0xc   : > { %s932_s9 = smov (!%p157_p4, %s726_s9), 1  ;;  %v648_v8 = vld [vmem:[%s925_s1] sm:$0xff]  ;;  %v650_v9 = vld [vmem:[%s925_s1 + $0x10] sm:$0xff]  ;;  %v649_v12 = vld [vmem:[%s925_s1 + $0x8] sm:$0xff]  ;;  %v429_v48 = vlaneseq  ;;  %vm481_vm2 = vcmask 64512  }
   0xd   : > { %s646_s13 = sshll.u32 %s932_s9, 6  ;;  %v654_v10 = vld [vmem:[%s925_s1 + $0x30] sm:$0xff]  ;;  %v652_v11 = vld [vmem:[%s925_s1 + $0x20] sm:$0xff]  ;;  %v651_v13 = vld [vmem:[%s925_s1 + $0x18] sm:$0xff]  ;;  %s647_s5 = sshll.u32 %s932_s9, 7 }
   0xe   : > { %s775_s16 = scalar_lea.vmem %s924_s0, %s646_s13  ;;  %v655_v14 = vld [vmem:[%s925_s1 + $0x38] sm:$0xff]  ;;  %v653_v15 = vld [vmem:[%s925_s1 + $0x28] sm:$0xff]  ;;  %v809_v49 = vand.u32 127, %v429_v48  ;;  %s819_s8 = scalar_lea.vmem %s926_s2, %s647_s5 }
   0xf   : > { %v663_v0 = vld [vmem:[%s775_s16 + $0x38] sm:$0xff]  ;;  %v662_v1 = vld [vmem:[%s775_s16 + $0x30] sm:$0xff]  ;;  %v661_v2 = vld [vmem:[%s775_s16 + $0x28] sm:$0xff] }
  0x10   : > { %300 = vmatpush.bf16.msra.mxu0 %v663_v0  ;;  %664 = vmatpush.bf16.msra.mxu1 %v663_v0  ;;  %v660_v3 = vld [vmem:[%s775_s16 + $0x20] sm:$0xff]  ;;  %v659_v4 = vld [vmem:[%s775_s16 + $0x18] sm:$0xff]  ;;  %v658_v5 = vld [vmem:[%s775_s16 + $0x10] sm:$0xff]  ;;  %vm431_vm0 = vcmp.eq.s32.totalorder %v809_v49, 0  ;;  %vm448_vm1 = vcmp.eq.s32.totalorder %v809_v49, 1 }
  0x11   : > { %666 = vmatpush.bf16.msra.mxu3 %v663_v0  ;;  %665 = vmatpush.bf16.msra.mxu2 %v663_v0  ;;  %v657_v6 = vld [vmem:[%s775_s16 + $0x8] sm:$0xff]  ;;  %v656_v7 = vld [vmem:[%s775_s16] sm:$0xff] }
  0x14   : > { %301 = vmatpush.bf16.msra.mxu0 %v662_v1  ;;  %667 = vmatpush.bf16.msra.mxu1 %v662_v1 }
  0x15   : > { %669 = vmatpush.bf16.msra.mxu3 %v662_v1  ;;  %668 = vmatpush.bf16.msra.mxu2 %v662_v1 }
  0x18   : > { %302 = vmatpush.bf16.msra.mxu0 %v661_v2  ;;  %670 = vmatpush.bf16.msra.mxu1 %v661_v2 }
  0x19   : > { %672 = vmatpush.bf16.msra.mxu3 %v661_v2  ;;  %671 = vmatpush.bf16.msra.mxu2 %v661_v2 }
  0x1c   : > { %303 = vmatpush.bf16.msra.mxu0 %v660_v3  ;;  %673 = vmatpush.bf16.msra.mxu1 %v660_v3 }
  0x1d   : > { %675 = vmatpush.bf16.msra.mxu3 %v660_v3  ;;  %674 = vmatpush.bf16.msra.mxu2 %v660_v3 }
  0x20   : > { %304 = vmatpush.bf16.msra.mxu0 %v659_v4  ;;  %676 = vmatpush.bf16.msra.mxu1 %v659_v4 }
  0x21   : > { %678 = vmatpush.bf16.msra.mxu3 %v659_v4  ;;  %677 = vmatpush.bf16.msra.mxu2 %v659_v4 }
  0x24   : > { %305 = vmatpush.bf16.msra.mxu0 %v658_v5  ;;  %679 = vmatpush.bf16.msra.mxu1 %v658_v5 }
  0x25   : > { %681 = vmatpush.bf16.msra.mxu3 %v658_v5  ;;  %680 = vmatpush.bf16.msra.mxu2 %v658_v5 }
  0x28   : > { %306 = vmatpush.bf16.msra.mxu0 %v657_v6  ;;  %682 = vmatpush.bf16.msra.mxu1 %v657_v6 }
  0x29   : > { %684 = vmatpush.bf16.msra.mxu3 %v657_v6  ;;  %683 = vmatpush.bf16.msra.mxu2 %v657_v6 }
  0x2c   : > { %307 = vmatpush.bf16.msra.mxu0 %v656_v7  ;;  %685 = vmatpush.bf16.msra.mxu1 %v656_v7 }
  0x2d   : > { %687 = vmatpush.bf16.msra.mxu3 %v656_v7  ;;  %686 = vmatpush.bf16.msra.mxu2 %v656_v7 }
  0x2f   : > { %308 = vmatmul.bf16.vlgmr.msra.gmra.mxu0 %v648_v8  ;;  %318 = vmatmul.bf16.vlgmr.msra.gmra.mxu1 %v650_v9 }
  0x30   : > { %338 = vmatmul.bf16.vlgmr.msra.gmra.mxu3 %v654_v10  ;;  %328 = vmatmul.bf16.vlgmr.msra.gmra.mxu2 %v652_v11 }
  0x3f   : > { %313 = vmatmul.bf16.gmra.mxu0 %v649_v12  ;;  %323 = vmatmul.bf16.gmra.mxu1 %v651_v13 }
  0x40   : > { %343 = vmatmul.bf16.gmra.mxu3 %v655_v14  ;;  %333 = vmatmul.bf16.gmra.mxu2 %v653_v15 }
  0xac   : > { %v309_v16 = vpop.f32.mrf.mxu0  ;;  %v319_v17 = vpop.f32.mrf.mxu1 }
  0xad   : > { %357 = vadd.xlane.f32.xlu2 %v319_v17  ;;  %349 = vadd.xlane.f32.xlu0 %v309_v16  ;;  %v381_v18 = vmul.f32 %v309_v16, %v309_v16  ;;  %v385_v19 = vmul.f32 %v319_v17, %v319_v17 }
  0xaf   : > { %397 = vadd.xlane.f32.xlu1 %v381_v18 }
  0xb3   : > { %v339_v20 = vpop.f32.mrf.mxu3  ;;  %v329_v22 = vpop.f32.mrf.mxu2 }
  0xb4   : > { %v393_v21 = vmul.f32 %v339_v20, %v339_v20  ;;  %v311_v23 = vpop.f32.mrf.mxu0  ;;  %v389_v25 = vmul.f32 %v329_v22, %v329_v22  ;;  %v321_v26 = vpop.f32.mrf.mxu1 }
  0xb5   : > { %405 = vadd.xlane.f32.xlu2 %v385_v19  ;;  %373 = vadd.xlane.f32.xlu0 %v339_v20  ;;  %v386_v29 = vmul.f32 %v321_v26, %v321_v26  ;;  %v382_v30 = vmul.f32 %v311_v23, %v311_v23 }
  0xb7   : > { %421 = vadd.xlane.f32.xlu1 %v393_v21 }
  0xbb   : > { %v341_v24 = vpop.f32.mrf.mxu3  ;;  %v331_v28 = vpop.f32.mrf.mxu2 }
  0xbc   : > { %v314_v27 = vpop.f32.mrf.mxu0  ;;  %v390_v31 = vmul.f32 %v331_v28, %v331_v28  ;;  %v324_v32 = vpop.f32.mrf.mxu1  ;;  %v394_v44 = vmul.f32 %v341_v24, %v341_v24 }
  0xbd   : > { %365 = vadd.xlane.f32.xlu2 %v329_v22  ;;  %351 = vadd.xlane.f32.xlu0 %v311_v23  ;;  %v387_v34 = vmul.f32 %v324_v32, %v324_v32  ;;  %v383_v39 = vmul.f32 %v314_v27, %v314_v27 }
  0xbf   : > { %375 = vadd.xlane.f32.xlu1 %v341_v24 }
  0xc3   : > { %v344_v33 = vpop.f32.mrf.mxu3  ;;  %v334_v35 = vpop.f32.mrf.mxu2 }
  0xc4   : > { %v391_v36 = vmul.f32 %v334_v35, %v334_v35  ;;  %v326_v37 = vpop.f32.mrf.mxu1  ;;  %v316_v40 = vpop.f32.mrf.mxu0  ;;  %v395_v46 = vmul.f32 %v344_v33, %v344_v33 }
  0xc5   : > { %359 = vadd.xlane.f32.xlu2 %v321_v26  ;;  %413 = vadd.xlane.f32.xlu0 %v389_v25  ;;  %v388_v38 = vmul.f32 %v326_v37, %v326_v37  ;;  %v384_v45 = vmul.f32 %v316_v40, %v316_v40 }
  0xc7   : > { %353 = vadd.xlane.f32.xlu1 %v314_v27 }
  0xcb   : > { %v336_v41 = vpop.f32.mrf.mxu2  ;;  %v346_v42 = vpop.f32.mrf.mxu3 }
  0xcc   : > { %v392_v43 = vmul.f32 %v336_v41, %v336_v41  ;;  %v396_v47 = vmul.f32 %v346_v42, %v346_v42 }
  0xcd   : > { %407 = vadd.xlane.f32.xlu0 %v386_v29  ;;  %399 = vadd.xlane.f32.xlu2 %v382_v30 }
  0xcf   : > { %415 = vadd.xlane.f32.xlu1 %v390_v31 }
  0xd5   : > { %367 = vadd.xlane.f32.xlu0 %v331_v28  ;;  %377 = vadd.xlane.f32.xlu2 %v344_v33 }
  0xd7   : > { %409 = vadd.xlane.f32.xlu1 %v387_v34 }
  0xdd   : > { %361 = vadd.xlane.f32.xlu0 %v324_v32  ;;  %417 = vadd.xlane.f32.xlu2 %v391_v36 }
  0xdf   : > { %369 = vadd.xlane.f32.xlu1 %v334_v35 }
  0xe5   : > { %411 = vadd.xlane.f32.xlu2 %v388_v38  ;;  %401 = vadd.xlane.f32.xlu0 %v383_v39 }
  0xe7   : > { %355 = vadd.xlane.f32.xlu1 %v316_v40 }
  0xed   : > { %371 = vadd.xlane.f32.xlu2 %v336_v41  ;;  %379 = vadd.xlane.f32.xlu0 %v346_v42 }
  0xef   : > { %363 = vadd.xlane.f32.xlu1 %v326_v37 }
  0xf5   : > { %423 = vadd.xlane.f32.xlu2 %v394_v44  ;;  %419 = vadd.xlane.f32.xlu0 %v392_v43 }
  0xf7   : > { %403 = vadd.xlane.f32.xlu1 %v384_v45 }
  0xfd   : > { %425 = vadd.xlane.f32.xlu0 %v395_v46 }
  0xff   : > { %427 = vadd.xlane.f32.xlu1 %v396_v47 }
 0x120   : > { %v358_v50 = vpop.xlane.xlu2 %357  ;;  %v350_v51 = vpop.xlane.xlu0 %349 }
 0x121   : > { %v432_v53 = vsel %vm431_vm0, %v350_v51, 0.0  ;;  %v436_v56 = vsel %vm431_vm0, %v358_v50, 0.0 }
 0x122   : > { %v398_v52 = vpop.xlane.xlu1 %397 }
 0x123   : > { %v449_v54 = vsel %vm448_vm1, %v398_v52, 0.0 }
 0x124   : > { %v465_v55 = vadd.f32 %v449_v54, %v432_v53 }
 0x126   : > { %482 = vst.msk [vmem:[%s819_s8] sm:$0xff] %vm481_vm2, %v465_v55 }
 0x128   : > { %v406_v57 = vpop.xlane.xlu2 %405  ;;  %v374_v58 = vpop.xlane.xlu0 %373 }
 0x129   : > { %v453_v59 = vsel %vm448_vm1, %v406_v57, 0.0  ;;  %v444_v62 = vsel %vm431_vm0, %v374_v58, 0.0 }
 0x12a   : > { %v469_v60 = vadd.f32 %v453_v59, %v436_v56  ;;  %v422_v61 = vpop.xlane.xlu1 %421 }
 0x12b   : > { %v461_v63 = vsel %vm448_vm1, %v422_v61, 0.0 }
 0x12c   : > { %486 = vst.msk [vmem:[%s819_s8 + $0x20] sm:$0xff] %vm481_vm2, %v469_v60  ;;  %v477_v0 = vadd.f32 %v461_v63, %v444_v62 }
 0x12e   : > { %494 = vst.msk [vmem:[%s819_s8 + $0x60] sm:$0xff] %vm481_vm2, %v477_v0 }
 0x130   : > { %v366_v1 = vpop.xlane.xlu2 %365  ;;  %v352_v2 = vpop.xlane.xlu0 %351 }
 0x131   : > { %v440_v4 = vsel %vm431_vm0, %v366_v1, 0.0  ;;  %v433_v12 = vsel %vm431_vm0, %v352_v2, 0.0 }
 0x132   : > { %v376_v3 = vpop.xlane.xlu1 %375 }
 0x133   : > { %v445_v48 = vsel %vm431_vm0, %v376_v3, 0.0 }
 0x138   : > { %v360_v5 = vpop.xlane.xlu2 %359  ;;  %v414_v6 = vpop.xlane.xlu0 %413 }
 0x139   : > { %v457_v7 = vsel %vm448_vm1, %v414_v6, 0.0  ;;  %v437_v13 = vsel %vm431_vm0, %v360_v5, 0.0 }
 0x13a   : > { %v473_v8 = vadd.f32 %v457_v7, %v440_v4  ;;  %v354_v9 = vpop.xlane.xlu1 %353 }
 0x13b   : > { %v434_v36 = vsel %vm431_vm0, %v354_v9, 0.0 }
 0x13c   : > { %490 = vst.msk [vmem:[%s819_s8 + $0x40] sm:$0xff] %vm481_vm2, %v473_v8 }
 0x140   : > { %v408_v10 = vpop.xlane.xlu0 %407  ;;  %v400_v11 = vpop.xlane.xlu2 %399 }
 0x141   : > { %v454_v14 = vsel %vm448_vm1, %v408_v10, 0.0  ;;  %v450_v15 = vsel %vm448_vm1, %v400_v11, 0.0 }
 0x142   : > { %v470_v16 = vadd.f32 %v454_v14, %v437_v13  ;;  %v466_v17 = vadd.f32 %v450_v15, %v433_v12  ;;  %v416_v18 = vpop.xlane.xlu1 %415 }
 0x143   : > { %v458_v21 = vsel %vm448_vm1, %v416_v18, 0.0 }
 0x144   : > { %487 = vst.msk [vmem:[%s819_s8 + $0x28] sm:$0xff] %vm481_vm2, %v470_v16 }
 0x145   : > { %483 = vst.msk [vmem:[%s819_s8 + $0x8] sm:$0xff] %vm481_vm2, %v466_v17 }
 0x148   : > { %v368_v19 = vpop.xlane.xlu0 %367  ;;  %v378_v20 = vpop.xlane.xlu2 %377 }
 0x149   : > { %v441_v22 = vsel %vm431_vm0, %v368_v19, 0.0  ;;  %v446_v60 = vsel %vm431_vm0, %v378_v20, 0.0 }
 0x14a   : > { %v474_v23 = vadd.f32 %v458_v21, %v441_v22  ;;  %v410_v24 = vpop.xlane.xlu1 %409 }
 0x14b   : > { %v455_v27 = vsel %vm448_vm1, %v410_v24, 0.0 }
 0x14c   : > { %491 = vst.msk [vmem:[%s819_s8 + $0x48] sm:$0xff] %vm481_vm2, %v474_v23 }
 0x150   : > { %v362_v25 = vpop.xlane.xlu0 %361  ;;  %v418_v26 = vpop.xlane.xlu2 %417 }
 0x151   : > { %v438_v28 = vsel %vm431_vm0, %v362_v25, 0.0  ;;  %v459_v29 = vsel %vm448_vm1, %v418_v26, 0.0 }
 0x152   : > { %v471_v30 = vadd.f32 %v455_v27, %v438_v28  ;;  %v370_v31 = vpop.xlane.xlu1 %369 }
 0x153   : > { %v442_v32 = vsel %vm431_vm0, %v370_v31, 0.0 }
 0x154   : > { %488 = vst.msk [vmem:[%s819_s8 + $0x30] sm:$0xff] %vm481_vm2, %v471_v30  ;;  %v475_v33 = vadd.f32 %v459_v29, %v442_v32 }
 0x156   : > { %492 = vst.msk [vmem:[%s819_s8 + $0x50] sm:$0xff] %vm481_vm2, %v475_v33 }
 0x158   : > { %v412_v34 = vpop.xlane.xlu2 %411  ;;  %v402_v35 = vpop.xlane.xlu0 %401 }
 0x159   : > { %v451_v37 = vsel %vm448_vm1, %v402_v35, 0.0  ;;  %v456_v43 = vsel %vm448_vm1, %v412_v34, 0.0 }
 0x15a   : > { %v467_v38 = vadd.f32 %v451_v37, %v434_v36  ;;  %v356_v39 = vpop.xlane.xlu1 %355 }
 0x15b   : > { %v435_v56 = vsel %vm431_vm0, %v356_v39, 0.0 }
 0x15c   : > { %484 = vst.msk [vmem:[%s819_s8 + $0x10] sm:$0xff] %vm481_vm2, %v467_v38 }
 0x160   : > { %v372_v40 = vpop.xlane.xlu2 %371  ;;  %v380_v41 = vpop.xlane.xlu0 %379 }
 0x161   : > { %v443_v50 = vsel %vm431_vm0, %v372_v40, 0.0  ;;  %v447_v0 = vsel %vm431_vm0, %v380_v41, 0.0 }
 0x162   : > { %v364_v42 = vpop.xlane.xlu1 %363 }
 0x163   : > { %v439_v44 = vsel %vm431_vm0, %v364_v42, 0.0 }
 0x164   : > { %v472_v45 = vadd.f32 %v456_v43, %v439_v44 }
 0x166   : > { %489 = vst.msk [vmem:[%s819_s8 + $0x38] sm:$0xff] %vm481_vm2, %v472_v45 }
 0x168   : > { %v424_v46 = vpop.xlane.xlu2 %423  ;;  %v420_v47 = vpop.xlane.xlu0 %419 }
 0x169   : > { %v462_v51 = vsel %vm448_vm1, %v424_v46, 0.0  ;;  %v460_v52 = vsel %vm448_vm1, %v420_v47, 0.0 }
 0x16a   : > { %v478_v53 = vadd.f32 %v462_v51, %v445_v48  ;;  %v476_v54 = vadd.f32 %v460_v52, %v443_v50  ;;  %v404_v55 = vpop.xlane.xlu1 %403 }
 0x16b   : > { %v452_v57 = vsel %vm448_vm1, %v404_v55, 0.0 }
 0x16c   : > { %495 = vst.msk [vmem:[%s819_s8 + $0x68] sm:$0xff] %vm481_vm2, %v478_v53  ;;  %v468_v58 = vadd.f32 %v452_v57, %v435_v56 }
 0x16d   : > { %493 = vst.msk [vmem:[%s819_s8 + $0x58] sm:$0xff] %vm481_vm2, %v476_v54 }
 0x16e   : > { %485 = vst.msk [vmem:[%s819_s8 + $0x18] sm:$0xff] %vm481_vm2, %v468_v58 }
 0x170   : > { %v426_v59 = vpop.xlane.xlu0 %425 }
 0x171   : > { %v463_v61 = vsel %vm448_vm1, %v426_v59, 0.0 }
 0x172   : > { %v479_v62 = vadd.f32 %v463_v61, %v446_v60  ;;  %v428_v63 = vpop.xlane.xlu1 %427 }
 0x173   : > { %v464_v1 = vsel %vm448_vm1, %v428_v63, 0.0 }
 0x174   : > { %496 = vst.msk [vmem:[%s819_s8 + $0x70] sm:$0xff] %vm481_vm2, %v479_v62  ;;  %v480_v2 = vadd.f32 %v464_v1, %v447_v0 }
 0x176   : > { %497 = vst.msk [vmem:[%s819_s8 + $0x78] sm:$0xff] %vm481_vm2, %v480_v2 }
 0x177 PF: > { %s12_s11 = sadd.s32 1, %s734_s11   ;;  %s927_s9 = smov %s730_s10 }
 0x178   : > { %p9_p5 = scmp.ge.s32.totalorder %s12_s11, 4   ;;  %s928_s10 = smov %s930_s12 }
 0x17a   :  { %11 = sbr.rel (!%p9_p5) target bundleno = 2 (0x2), region = 58 }

// kernel: conv_layer_forward.3
= control target key start
LH: loop header
LB: loop body
LE: loop exit
PB: predicated region body
PF: predicated region fallthrough
CT: control target
= control target key end

     0   :  { %s1324_s15 = smov 0   ;;  %s1326_s16 = smov 0   ;;  %s1828_s0 = inlined_call_operand.vmem [shape: bf16[2,128,128], index: 0, kind: input, shape index: {}]   ;;  %s1829_s1 = inlined_call_operand.vmem [shape: bf16[128,128], index: 1, kind: input, shape index: {}]   ;;  %s1830_s2 = inlined_call_operand.vmem [shape: f32[128,8], index: 2, kind: input, shape index: {}]   ;;  %s1831_s3 = inlined_call_operand.vmem [shape: f32[128,8], index: 3, kind: input, shape index: {}]   ;;  %s1832_s4 = inlined_call_operand.vmem [shape: f32[2,128,128], index: 4, kind: output, shape index: {}]  }
   0x1   :  { %s1328_s17 = smov 0  }
   0x2 LB: > { %s26_s18 = sadd.s32 1, %s1292_s16  ;;  %p1053_p0 = scmp.ge.s32.totalorder %s1296_s17, 1  ;;  %s1296_s17 = sphi %s1328_s17, %s14_s17   ;;  %s1292_s16 = sphi %s1326_s16, %s1858_s16   ;;  %s1288_s15 = sphi %s1324_s15, %s1857_s15  }
   0x3   : > { %p28_p1 = scmp.ge.s32.totalorder %s26_s18, 2  ;;  %p181_p2 = scmp.lt.s32.totalorder %s1296_s17, 3 }
   0x5   : > { %s1860_s18 = smov (%p28_p1, %s26_s18), 0  ;;  %p182_p3 = pnand %p1053_p0, %p181_p2 }
   0x6   : > { %p213_p4 = scmp.lt.s32.totalorder (!%p182_p3), %s1288_s15, 1 }
   0x7   : > { %185 = sbr.rel (%p182_p3) target bundleno = 272 (0x110), region = 36 }
   0xc   : > { %v410_v0 = vld [vmem:[%s1830_s2 + $0x20] sm:$0xff]  ;;  %v408_v1 = vld [vmem:[%s1830_s2 + $0x10] sm:$0xff]  ;;  %v1298_v3 = vmov 0   ;;  %s1862_s15 = smov (!%p213_p4, %s1288_s15), 1  ;;  %v411_v5 = vld [vmem:[%s1830_s2 + $0x28] sm:$0xff] }
   0xd   : > { %v406_v2 = vld [vmem:[%s1830_s2] sm:$0xff]  ;;  %1209 = vset.pattern.permute.xlu2 %v1298_v3  ;;  %1208 = vset.pattern.permute.xlu1 %v1298_v3  ;;  %s1140_s25 = sshll.u32 %s1862_s15, 6  ;;  %v409_v6 = vld [vmem:[%s1830_s2 + $0x18] sm:$0xff]  ;;  %v407_v7 = vld [vmem:[%s1830_s2 + $0x8] sm:$0xff] }
   0xe   : > { %1207 = vset.pattern.permute.xlu0 %v1298_v3  ;;  %444 = vperm.xlu2 %1209, %v410_v0   ;;  %s1357_s28 = scalar_lea.vmem %s1828_s0, %s1140_s25  ;;  %v414_v10 = vld [vmem:[%s1830_s2 + $0x40] sm:$0xff]  ;;  %v413_v11 = vld [vmem:[%s1830_s2 + $0x38] sm:$0xff]  ;;  %v412_v12 = vld [vmem:[%s1830_s2 + $0x30] sm:$0xff] }
   0xf   : > { %434 = vperm.xlu1 %1208, %v408_v1   ;;  %424 = vperm.xlu0 %1207, %v406_v2   ;;  %v1157_v4 = vld [vmem:[%s1357_s28 + $0x38] sm:$0xff]  ;;  %v1156_v8 = vld [vmem:[%s1357_s28 + $0x30] sm:$0xff]  ;;  %v1155_v9 = vld [vmem:[%s1357_s28 + $0x28] sm:$0xff] }
  0x10   : > { %357 = vmatpush.bf16.msra.mxu0 %v1157_v4  ;;  %1158 = vmatpush.bf16.msra.mxu1 %v1157_v4  ;;  %v1154_v13 = vld [vmem:[%s1357_s28 + $0x20] sm:$0xff]  ;;  %v1153_v14 = vld [vmem:[%s1357_s28 + $0x18] sm:$0xff]  ;;  %v416_v16 = vld [vmem:[%s1830_s2 + $0x50] sm:$0xff] }
  0x11   : > { %1159 = vmatpush.bf16.msra.mxu2 %v1157_v4  ;;  %1160 = vmatpush.bf16.msra.mxu3 %v1157_v4  ;;  %v417_v15 = vld [vmem:[%s1830_s2 + $0x58] sm:$0xff]  ;;  %v415_v17 = vld [vmem:[%s1830_s2 + $0x48] sm:$0xff]  ;;  %v1152_v18 = vld [vmem:[%s1357_s28 + $0x10] sm:$0xff] }
  0x12   : > { %v1151_v19 = vld [vmem:[%s1357_s28 + $0x8] sm:$0xff]  ;;  %v420_v20 = vld [vmem:[%s1830_s2 + $0x70] sm:$0xff]  ;;  %v418_v22 = vld [vmem:[%s1830_s2 + $0x60] sm:$0xff] }
  0x13   : > { %v419_v21 = vld [vmem:[%s1830_s2 + $0x68] sm:$0xff]  ;;  %v1150_v23 = vld [vmem:[%s1357_s28] sm:$0xff]  ;;  %v1144_v25 = vld [vmem:[%s1829_s1 + $0x10] sm:$0xff]  ;;  %s1141_s28 = sshll.u32 %s1862_s15, 7 }
  0x14   : > { %358 = vmatpush.bf16.msra.mxu0 %v1156_v8  ;;  %1161 = vmatpush.bf16.msra.mxu1 %v1156_v8  ;;  %v1142_v24 = vld [vmem:[%s1829_s1] sm:$0xff]  ;;  %v1148_v27 = vld [vmem:[%s1829_s1 + $0x30] sm:$0xff]  ;;  %v519_v28 = vld [vmem:[%s1831_s3 + $0x8] sm:$0xff]  ;;  %s1576_s13 = scalar_lea.vmem %s1832_s4, %s1141_s28 }
  0x15   : > { %1162 = vmatpush.bf16.msra.mxu2 %v1156_v8  ;;  %1163 = vmatpush.bf16.msra.mxu3 %v1156_v8  ;;  %v1146_v26 = vld [vmem:[%s1829_s1 + $0x20] sm:$0xff]  ;;  %v421_v30 = vld [vmem:[%s1830_s2 + $0x78] sm:$0xff]  ;;  %v520_v33 = vld [vmem:[%s1831_s3 + $0x10] sm:$0xff] }
  0x16   : > { %449 = vperm.xlu2 %1209, %v411_v5   ;;  %v518_v29 = vld [vmem:[%s1831_s3] sm:$0xff]  ;;  %v521_v32 = vld [vmem:[%s1831_s3 + $0x18] sm:$0xff]  ;;  %v1143_v34 = vld [vmem:[%s1829_s1 + $0x8] sm:$0xff] }
  0x17   : > { %439 = vperm.xlu1 %1208, %v409_v6   ;;  %429 = vperm.xlu0 %1207, %v407_v7   ;;  %v522_v31 = vld [vmem:[%s1831_s3 + $0x20] sm:$0xff]  ;;  %v1145_v35 = vld [vmem:[%s1829_s1 + $0x18] sm:$0xff]  ;;  %v1147_v36 = vld [vmem:[%s1829_s1 + $0x28] sm:$0xff] }
  0x18   : > { %359 = vmatpush.bf16.msra.mxu0 %v1155_v9  ;;  %1164 = vmatpush.bf16.msra.mxu1 %v1155_v9  ;;  %v1149_v37 = vld [vmem:[%s1829_s1 + $0x38] sm:$0xff]  ;;  %v524_v39 = vld [vmem:[%s1831_s3 + $0x30] sm:$0xff]  ;;  %v523_v40 = vld [vmem:[%s1831_s3 + $0x28] sm:$0xff] }
  0x19   : > { %1165 = vmatpush.bf16.msra.mxu2 %v1155_v9  ;;  %1166 = vmatpush.bf16.msra.mxu3 %v1155_v9  ;;  %v525_v38 = vld [vmem:[%s1831_s3 + $0x38] sm:$0xff]  ;;  %v528_v41 = vld [vmem:[%s1831_s3 + $0x50] sm:$0xff]  ;;  %v527_v42 = vld [vmem:[%s1831_s3 + $0x48] sm:$0xff] }
  0x1a   : > { %v526_v43 = vld [vmem:[%s1831_s3 + $0x40] sm:$0xff]  ;;  %v531_v44 = vld [vmem:[%s1831_s3 + $0x68] sm:$0xff]  ;;  %v529_v46 = vld [vmem:[%s1831_s3 + $0x58] sm:$0xff] }
  0x1b   : > { %v530_v45 = vld [vmem:[%s1831_s3 + $0x60] sm:$0xff]  ;;  %v533_v47 = vld [vmem:[%s1831_s3 + $0x78] sm:$0xff]  ;;  %v532_v48 = vld [vmem:[%s1831_s3 + $0x70] sm:$0xff] }
  0x1c   : > { %360 = vmatpush.bf16.msra.mxu0 %v1154_v13  ;;  %1167 = vmatpush.bf16.msra.mxu1 %v1154_v13 }
  0x1d   : > { %1168 = vmatpush.bf16.msra.mxu2 %v1154_v13  ;;  %1169 = vmatpush.bf16.msra.mxu3 %v1154_v13 }
  0x1e   : > { %464 = vperm.xlu2 %1209, %v414_v10  }
  0x1f   : > { %459 = vperm.xlu1 %1208, %v413_v11   ;;  %454 = vperm.xlu0 %1207, %v412_v12  }
  0x20   : > { %361 = vmatpush.bf16.msra.mxu0 %v1153_v14  ;;  %1170 = vmatpush.bf16.msra.mxu1 %v1153_v14 }
  0x21   : > { %1171 = vmatpush.bf16.msra.mxu2 %v1153_v14  ;;  %1172 = vmatpush.bf16.msra.mxu3 %v1153_v14 }
  0x24   : > { %362 = vmatpush.bf16.msra.mxu0 %v1152_v18  ;;  %1173 = vmatpush.bf16.msra.mxu1 %v1152_v18 }
  0x25   : > { %1174 = vmatpush.bf16.msra.mxu2 %v1152_v18  ;;  %1175 = vmatpush.bf16.msra.mxu3 %v1152_v18 }
  0x26   : > { %479 = vperm.xlu2 %1209, %v417_v15  }
  0x27   : > { %474 = vperm.xlu1 %1208, %v416_v16   ;;  %469 = vperm.xlu0 %1207, %v415_v17  }
  0x28   : > { %363 = vmatpush.bf16.msra.mxu0 %v1151_v19  ;;  %1176 = vmatpush.bf16.msra.mxu1 %v1151_v19 }
  0x29   : > { %1177 = vmatpush.bf16.msra.mxu2 %v1151_v19  ;;  %1178 = vmatpush.bf16.msra.mxu3 %v1151_v19 }
  0x2c   : > { %364 = vmatpush.bf16.msra.mxu0 %v1150_v23  ;;  %1179 = vmatpush.bf16.msra.mxu1 %v1150_v23 }
  0x2d   : > { %1180 = vmatpush.bf16.msra.mxu2 %v1150_v23  ;;  %1181 = vmatpush.bf16.msra.mxu3 %v1150_v23 }
  0x2e   : > { %494 = vperm.xlu2 %1209, %v420_v20  }
  0x2f   : > { %489 = vperm.xlu1 %1208, %v419_v21   ;;  %484 = vperm.xlu0 %1207, %v418_v22  }
  0x30   : > { %365 = vmatmul.bf16.vlgmr.msra.gmra.mxu0 %v1142_v24  ;;  %375 = vmatmul.bf16.vlgmr.msra.gmra.mxu1 %v1144_v25 }
  0x31   : > { %385 = vmatmul.bf16.vlgmr.msra.gmra.mxu2 %v1146_v26  ;;  %395 = vmatmul.bf16.vlgmr.msra.gmra.mxu3 %v1148_v27 }
  0x36   : > { %541 = vperm.xlu2 %1209, %v519_v28  }
  0x37   : > { %536 = vperm.xlu1 %1208, %v518_v29   ;;  %499 = vperm.xlu0 %1207, %v421_v30  }
  0x3e   : > { %556 = vperm.xlu2 %1209, %v522_v31  }
  0x3f   : > { %551 = vperm.xlu1 %1208, %v521_v32   ;;  %546 = vperm.xlu0 %1207, %v520_v33  }
  0x40   : > { %370 = vmatmul.bf16.gmra.mxu0 %v1143_v34  ;;  %380 = vmatmul.bf16.gmra.mxu1 %v1145_v35 }
  0x41   : > { %390 = vmatmul.bf16.gmra.mxu2 %v1147_v36  ;;  %400 = vmatmul.bf16.gmra.mxu3 %v1149_v37 }
  0x46   : > { %571 = vperm.xlu2 %1209, %v525_v38  }
  0x47   : > { %566 = vperm.xlu1 %1208, %v524_v39   ;;  %561 = vperm.xlu0 %1207, %v523_v40  }
  0x4e   : > { %586 = vperm.xlu2 %1209, %v528_v41  }
  0x4f   : > { %581 = vperm.xlu1 %1208, %v527_v42   ;;  %576 = vperm.xlu0 %1207, %v526_v43  }
  0x56   : > { %601 = vperm.xlu2 %1209, %v531_v44  }
  0x57   : > { %596 = vperm.xlu1 %1208, %v530_v45   ;;  %591 = vperm.xlu0 %1207, %v529_v46  }
  0x5f   : > { %611 = vperm.xlu1 %1208, %v533_v47   ;;  %606 = vperm.xlu0 %1207, %v532_v48  }
  0x68   : > { %v445_v49 = vpop.permute.xlu2 %444 }
  0x70   : > { %v450_v50 = vpop.permute.xlu2 %449 }
  0x78   : > { %v465_v51 = vpop.permute.xlu2 %464 }
  0x80   : > { %v1478_v54 = vpop.permute.xlu2 %479 }
  0x81   : > { %v435_v52 = vpop.permute.xlu1 %434  ;;  %v425_v53 = vpop.permute.xlu0 %424 }
  0x88   : > { %v1482_v57 = vpop.permute.xlu2 %494 }
  0x89   : > { %v1480_v55 = vpop.permute.xlu1 %439  ;;  %v430_v56 = vpop.permute.xlu0 %429 }
  0x90   : > { %v542_v62 = vpop.permute.xlu2 %541 }
  0x91   : > { %v1484_v58 = vpop.permute.xlu1 %459  ;;  %v455_v59 = vpop.permute.xlu0 %454 }
  0x98   : > { %v557_v1 = vpop.permute.xlu2 %556 }
  0x99   : > { %v1486_v60 = vpop.permute.xlu1 %474  ;;  %v470_v61 = vpop.permute.xlu0 %469 }
  0xa0   : > { %v1492_v4 = vpop.permute.xlu2 %571 }
  0xa1   : > { %v490_v63 = vpop.permute.xlu1 %489  ;;  %v1488_v0 = vpop.permute.xlu0 %484 }
  0xa8   : > { %v1502_v17 = vpop.permute.xlu2 %586 }
  0xa9   : > { %v537_v2 = vpop.permute.xlu1 %536  ;;  %v1490_v3 = vpop.permute.xlu0 %499 }
  0xad   : > { %v366_v5 = vpop.f32.mrf.mxu0  ;;  %v376_v9 = vpop.f32.mrf.mxu1 }
  0xae   : > { %v502_v8 = vmul.f32 %v425_v53, %v366_v5  ;;  %v506_v11 = vmul.f32 %v445_v49, %v376_v9 }
  0xb0   : > { %v1496_v10 = vadd.f32 %v537_v2, %v502_v8  ;;  %v1499_v13 = vadd.f32 %v557_v1, %v506_v11  ;;  %v602_v43 = vpop.permute.xlu2 %601 }
  0xb1   : > { %v1494_v6 = vpop.permute.xlu1 %551  ;;  %v547_v7 = vpop.permute.xlu0 %546 }
  0xb2   : > { %v1122_v12 = vmul.f32 -1.442695, %v1496_v10  ;;  %v1126_v14 = vmul.f32 -1.442695, %v1499_v13 }
  0xb4   : > { %1210 = vpow2.f32 %v1122_v12  ;;  %v386_v15 = vpop.f32.mrf.mxu2  ;;  %v396_v16 = vpop.f32.mrf.mxu3 }
  0xb5   : > { %v368_v18 = vpop.f32.mrf.mxu0  ;;  %1212 = vpow2.f32 %v1126_v14  ;;  %v378_v22 = vpop.f32.mrf.mxu1  ;;  %v510_v33 = vmul.f32 %v465_v51, %v386_v15  ;;  %v1538_v2 = vmul.f32 %v1488_v0, %v396_v16 }
  0xb6   : > { %v503_v21 = vmul.f32 %v430_v56, %v368_v18  ;;  %v507_v24 = vmul.f32 %v450_v50, %v378_v22 }
  0xb8   : > { %v1504_v23 = vadd.f32 %v542_v62, %v503_v21 }
  0xb9   : > { %v567_v19 = vpop.permute.xlu1 %566  ;;  %v562_v20 = vpop.permute.xlu0 %561 }
  0xba   : > { %v1211_v25 = vpop.eup %1210  ;;  %v1123_v26 = vmul.f32 -1.442695, %v1504_v23  ;;  %v1507_v27 = vadd.f32 %v562_v20, %v507_v24 }
  0xbb   : > { %v1509_v28 = vadd.f32 1.0, %v1211_v25  ;;  %v1213_v29 = vpop.eup %1212 }
  0xbc   : > { %1214 = vpow2.f32 %v1123_v26  ;;  %v1127_v30 = vmul.f32 -1.442695, %v1507_v27  ;;  %v388_v31 = vpop.f32.mrf.mxu2  ;;  %v398_v32 = vpop.f32.mrf.mxu3  ;;  %v1513_v35 = vadd.f32 1.0, %v1213_v29 }
  0xbd   : > { %1216 = vrcp.f32 %v1509_v28  ;;  %v371_v34 = vpop.f32.mrf.mxu0  ;;  %v511_v36 = vmul.f32 %v470_v61, %v388_v31  ;;  %v515_v37 = vmul.f32 %v490_v63, %v398_v32  ;;  %v381_v42 = vpop.f32.mrf.mxu1  ;;  %v703_v44 = vand.u32 2147483647, %v1509_v28 }
  0xbe   : > { %1218 = vpow2.f32 %v1127_v30  ;;  %v504_v41 = vmul.f32 %v435_v52, %v371_v34  ;;  %v705_v45 = vand.u32 2147483648, %v1509_v28  ;;  %v763_v50 = vand.u32 2147483647, %v1513_v35 }
  0xbf   : > { %1220 = vrcp.f32 %v1513_v35  ;;  %v1520_v46 = vadd.f32 %v602_v43, %v515_v37  ;;  %v508_v51 = vmul.f32 %v455_v59, %v381_v42  ;;  %vm699_vm0 = vweird.f32 %v1509_v28 }
  0xc0   : > { %v1529_v61 = vadd.f32 %v547_v7, %v504_v41  ;;  %vm1533_vm1 = vcmp.eq.f32.partialorder %v703_v44, 8.507059e+37  ;;  %v706_v59 = vor.u32 1.1754944e-38, %v705_v45  ;;  %v765_v5 = vand.u32 2147483648, %v1513_v35 }
  0xc1   : > { %v582_v38 = vpop.permute.xlu1 %581  ;;  %v577_v39 = vpop.permute.xlu0 %576  ;;  %v1135_v56 = vmul.f32 -1.442695, %v1520_v46  ;;  %v1545_v12 = vadd.f32 %v567_v19, %v508_v51  ;;  %vm759_vm2 = vweird.f32 %v1513_v35  ;;  %vm1549_vm3 = vcmp.eq.f32.partialorder %v763_v50, 8.507059e+37 }
  0xc2   : > { %v1515_v40 = vadd.f32 %v577_v39, %v510_v33  ;;  %v1522_v47 = vadd.f32 %v582_v38, %v511_v36  ;;  %v1215_v49 = vpop.eup %1214  ;;  %v1124_v15 = vmul.f32 -1.442695, %v1529_v61  ;;  %v766_v19 = vor.u32 1.1754944e-38, %v765_v5 }
  0xc3   : > { %v1217_v53 = vpop.eup %1216  ;;  %v1526_v52 = vadd.f32 1.0, %v1215_v49  ;;  %v1128_v26 = vmul.f32 -1.442695, %v1545_v12 }
  0xc4   : > { %v1130_v48 = vmul.f32 -1.442695, %v1515_v40  ;;  %v1219_v62 = vpop.eup %1218  ;;  %v695_v63 = vmul.f32 %v1217_v53, %v1509_v28  ;;  %v1131_v7 = vmul.f32 -1.442695, %v1522_v47  ;;  %vm700_vm4 = vweird.f32 %v1217_v53  ;;  %v391_v33 = vpop.f32.mrf.mxu2 }
  0xc5   : > { %v1221_v8 = vpop.eup %1220  ;;  %v1543_v11 = vadd.f32 1.0, %v1219_v62  ;;  %v718_v18 = vand.u32 2147483647, %v1526_v52  ;;  %v720_v22 = vand.u32 2147483648, %v1526_v52  ;;  %vm714_vm6 = vweird.f32 %v1526_v52  ;;  %vm701_vm7 = vmor %vm699_vm0, %vm700_vm4 }
  0xc6   : > { %1222 = vpow2.f32 %v1130_v48  ;;  %v696_v9 = vsub.f32 1.0, %v695_v63  ;;  %v755_v14 = vmul.f32 %v1221_v8, %v1513_v35  ;;  %vm760_vm5 = vweird.f32 %v1221_v8 }
  0xc7   : > { %1224 = vrcp.f32 %v1526_v52  ;;  %v778_v31 = vand.u32 2147483647, %v1543_v11  ;;  %v780_v32 = vand.u32 2147483648, %v1543_v11  ;;  %vm1568_vm8 = vcmp.eq.f32.partialorder %v718_v18, 8.507059e+37  ;;  %vm761_vm9 = vmor %vm759_vm2, %vm760_vm5 }
  0xc8   : > { %1226 = vpow2.f32 %v1135_v56  ;;  %v697_v16 = vmul.f32 %v1217_v53, %v696_v9  ;;  %v756_v21 = vsub.f32 1.0, %v755_v14  ;;  %v721_v41 = vor.u32 1.1754944e-38, %v720_v22 }
  0xc9   : > { %1228 = vrcp.f32 %v1543_v11  ;;  %vm774_vm10 = vweird.f32 %v1543_v11  ;;  %v512_v48 = vmul.f32 %v1486_v60, %v391_v33  ;;  %vm1589_vm11 = vcmp.eq.f32.partialorder %v778_v31, 8.507059e+37 }
  0xca   : > { %1230 = vpow2.f32 %v1131_v7  ;;  %v698_v24 = vadd.f32 %v1217_v53, %v697_v16  ;;  %v757_v30 = vmul.f32 %v1221_v8, %v756_v21  ;;  %v781_v56 = vor.u32 1.1754944e-38, %v780_v32 }
  0xcb   : > { %1232 = vpow2.f32 %v1124_v15 }
  0xcc   : > { %v1223_v20 = vpop.eup %1222  ;;  %v702_v36 = vsel %vm701_vm7, %v1217_v53, %v698_v24  ;;  %v758_v39 = vadd.f32 %v1221_v8, %v757_v30 }
  0xcd   : > { %v1559_v25 = vadd.f32 1.0, %v1223_v20  ;;  %v1225_v29 = vpop.eup %1224  ;;  %v707_v28 = vsel %vm1533_vm1, %v706_v59, %v702_v36  ;;  %v1640_v36 = vpop.f32.mrf.mxu3 }
  0xce   : > { %v1227_v34 = vpop.eup %1226  ;;  %v710_v37 = vmul.f32 %v1225_v29, %v1526_v52  ;;  %v934_v44 = vmul.f32 %v707_v28, %v1496_v10  ;;  %v762_v50 = vsel %vm761_vm9, %v1221_v8, %v758_v39  ;;  %vm715_vm12 = vweird.f32 %v1225_v29 }
  0xcf   : > { %1234 = vrcp.f32 %v1559_v25  ;;  %v1580_v42 = vadd.f32 1.0, %v1227_v34  ;;  %v1229_v43 = vpop.eup %1228  ;;  %v767_v10 = vsel %vm1549_vm3, %v766_v19, %v762_v50  ;;  %v823_v59 = vand.u32 2147483647, %v1559_v25  ;;  %vm716_vm13 = vmor %vm714_vm6, %vm715_vm12 }
  0xd0   : > { %v711_v45 = vsub.f32 1.0, %v710_v37  ;;  %v1231_v49 = vpop.eup %1230  ;;  %v770_v51 = vmul.f32 %v1229_v43, %v1543_v11  ;;  %950 = vst [vmem:[%s1576_s13] sm:$0xff] %v934_v44  ;;  %v938_v62 = vmul.f32 %v767_v10, %v1499_v13  ;;  %v825_v14 = vand.u32 2147483648, %v1559_v25 }
  0xd1   : > { %1236 = vrcp.f32 %v1580_v42  ;;  %v1233_v60 = vpop.eup %1232  ;;  %v1598_v1 = vadd.f32 1.0, %v1231_v49  ;;  %v898_v8 = vand.u32 2147483647, %v1580_v42  ;;  %v900_v9 = vand.u32 2147483648, %v1580_v42 }
  0xd2   : > { %v712_v35 = vmul.f32 %v1225_v29, %v711_v45  ;;  %1238 = vpow2.f32 %v1128_v26  ;;  %v771_v63 = vsub.f32 1.0, %v770_v51  ;;  %954 = vst [vmem:[%s1576_s13 + $0x20] sm:$0xff] %v938_v62  ;;  %vm775_vm14 = vweird.f32 %v1229_v43  ;;  %v597_v45 = vpop.permute.xlu1 %596 }
  0xd3   : > { %1240 = vrcp.f32 %v1598_v1  ;;  %v1611_v13 = vadd.f32 %v1502_v17, %v512_v48  ;;  %vm894_vm15 = vweird.f32 %v1580_v42  ;;  %vm819_vm0 = vweird.f32 %v1559_v25  ;;  %vm776_vm2 = vmor %vm774_vm10, %vm775_vm14  ;;  %v1649_v48 = vpop.permute.xlu0 %591 }
  0xd4   : > { %v713_v7 = vadd.f32 %v1225_v29, %v712_v35  ;;  %v772_v0 = vmul.f32 %v1229_v43, %v771_v63  ;;  %vm1619_vm1 = vcmp.eq.f32.partialorder %v823_v59, 8.507059e+37  ;;  %v1623_v17 = vadd.f32 1.0, %v1233_v60 }
  0xd5   : > { %v1601_v5 = vpop.eup %1234  ;;  %vm1629_vm3 = vcmp.eq.f32.partialorder %v898_v8, 8.507059e+37  ;;  %v826_v30 = vor.u32 1.1754944e-38, %v825_v14  ;;  %v838_v32 = vand.u32 2147483647, %v1598_v1  ;;  %vm834_vm4 = vweird.f32 %v1598_v1 }
  0xd6   : > { %v717_v15 = vsel %vm716_vm13, %v1225_v29, %v713_v7  ;;  %v815_v16 = vmul.f32 %v1601_v5, %v1559_v25  ;;  %v773_v20 = vadd.f32 %v1229_v43, %v772_v0  ;;  %v901_v29 = vor.u32 1.1754944e-38, %v900_v9  ;;  %v383_v9 = vpop.f32.mrf.mxu1 }
  0xd7   : > { %v1237_v18 = vpop.eup %1236  ;;  %v722_v52 = vsel %vm1568_vm8, %v721_v41, %v717_v15  ;;  %1242 = vrcp.f32 %v1623_v17  ;;  %v840_v34 = vand.u32 2147483648, %v1598_v1  ;;  %vm820_vm5 = vweird.f32 %v1601_v5 }
  0xd8   : > { %v1239_v19 = vpop.eup %1238  ;;  %v935_v22 = vmul.f32 %v722_v52, %v1504_v23  ;;  %v890_v24 = vmul.f32 %v1237_v18, %v1580_v42  ;;  %v777_v31 = vsel %vm776_vm2, %v1229_v43, %v773_v20  ;;  %v816_v33 = vsub.f32 1.0, %v815_v16  ;;  %vm821_vm8 = vmor %vm819_vm0, %vm820_vm5  ;;  %v373_v42 = vpop.f32.mrf.mxu0 }
  0xd9   : > { %v782_v23 = vsel %vm1589_vm11, %v781_v56, %v777_v31  ;;  %v1241_v37 = vpop.eup %1240  ;;  %v1645_v39 = vadd.f32 1.0, %v1239_v19  ;;  %vm895_vm6 = vweird.f32 %v1237_v18  ;;  %v733_v44 = vand.u32 2147483647, %v1623_v17 }
  0xda   : > { %951 = vst [vmem:[%s1576_s13 + $0x8] sm:$0xff] %v935_v22  ;;  %v891_v11 = vsub.f32 1.0, %v890_v24  ;;  %v939_v38 = vmul.f32 %v782_v23, %v1507_v27  ;;  %v817_v28 = vmul.f32 %v1601_v5, %v816_v33  ;;  %v830_v43 = vmul.f32 %v1241_v37, %v1598_v1  ;;  %vm896_vm10 = vmor %vm894_vm15, %vm895_vm6  ;;  %v612_v23 = vpop.permute.xlu1 %611 }
  0xdb   : > { %vm1652_vm7 = vcmp.eq.f32.partialorder %v838_v32, 8.507059e+37  ;;  %v735_v50 = vand.u32 2147483648, %v1623_v17  ;;  %1244 = vrcp.f32 %v1645_v39  ;;  %v841_v56 = vor.u32 1.1754944e-38, %v840_v34 }
  0xdc   : > { %v892_v41 = vmul.f32 %v1237_v18, %v891_v11  ;;  %955 = vst [vmem:[%s1576_s13 + $0x28] sm:$0xff] %v939_v38  ;;  %v818_v27 = vadd.f32 %v1601_v5, %v817_v28  ;;  %v831_v53 = vsub.f32 1.0, %v830_v43  ;;  %vm729_vm9 = vweird.f32 %v1623_v17  ;;  %v607_v11 = vpop.permute.xlu0 %606 }
  0xdd   : > { %v1243_v10 = vpop.eup %1242  ;;  %vm835_vm11 = vweird.f32 %v1241_v37  ;;  %v1132_v60 = vmul.f32 -1.442695, %v1611_v13  ;;  %v1670_v62 = vadd.f32 %v597_v45, %v1538_v2  ;;  %vm1675_vm12 = vcmp.eq.f32.partialorder %v733_v44, 8.507059e+37 }
  0xde   : > { %v893_v51 = vadd.f32 %v1237_v18, %v892_v41  ;;  %v822_v35 = vsel %vm821_vm8, %v1601_v5, %v818_v27  ;;  %v832_v59 = vmul.f32 %v1241_v37, %v831_v53  ;;  %v725_v7 = vmul.f32 %v1243_v10, %v1623_v17  ;;  %vm836_vm14 = vmor %vm834_vm4, %vm835_vm11 }
  0xdf   : > { %v827_v25 = vsel %vm1619_vm1, %v826_v30, %v822_v35  ;;  %v736_v14 = vor.u32 1.1754944e-38, %v735_v50  ;;  %v793_v0 = vand.u32 2147483647, %v1645_v39  ;;  %vm789_vm13 = vweird.f32 %v1645_v39 }
  0xe0   : > { %v897_v63 = vsel %vm896_vm10, %v1237_v18, %v893_v51  ;;  %v942_v2 = vmul.f32 %v827_v25, %v1515_v40  ;;  %v833_v16 = vadd.f32 %v1241_v37, %v832_v59  ;;  %v726_v18 = vsub.f32 1.0, %v725_v7 }
  0xe1   : > { %v902_v5 = vsel %vm1629_vm3, %v901_v29, %v897_v63  ;;  %v795_v52 = vand.u32 2147483648, %v1645_v39  ;;  %v1245_v20 = vpop.eup %1244  ;;  %1246 = vpow2.f32 %v1132_v60  ;;  %v1134_v40 = vmul.f32 -1.442695, %v1670_v62  ;;  %v403_v29 = vpop.f32.mrf.mxu3 }
  0xe2   : > { %v947_v15 = vmul.f32 %v902_v5, %v1520_v46  ;;  %958 = vst [vmem:[%s1576_s13 + $0x40] sm:$0xff] %v942_v2  ;;  %v505_v21 = vmul.f32 %v1480_v55, %v373_v42  ;;  %v509_v19 = vmul.f32 %v1484_v58, %v383_v9  ;;  %v393_v46 = vpop.f32.mrf.mxu2  ;;  %v837_v22 = vsel %vm836_vm14, %v1241_v37, %v833_v16 }
  0xe3   : > { %v727_v24 = vmul.f32 %v1243_v10, %v726_v18  ;;  %vm730_vm15 = vweird.f32 %v1243_v10  ;;  %v785_v26 = vmul.f32 %v1245_v20, %v1645_v39  ;;  %v842_v1 = vsel %vm1652_vm7, %v841_v56, %v837_v22 }
  0xe4   : > { %963 = vst [vmem:[%s1576_s13 + $0x68] sm:$0xff] %v947_v15  ;;  %1248 = vpow2.f32 %v1134_v40  ;;  %v1698_v30 = vadd.f32 %v1494_v6, %v505_v21  ;;  %v1701_v55 = vadd.f32 %v1492_v4, %v509_v19  ;;  %v943_v58 = vmul.f32 %v842_v1, %v1522_v47  ;;  %vm731_vm0 = vmor %vm729_vm9, %vm730_vm15 }
  0xe5   : > { %v728_v31 = vadd.f32 %v1243_v10, %v727_v24  ;;  %v786_v32 = vsub.f32 1.0, %v785_v26  ;;  %v513_v33 = vmul.f32 %v1478_v54, %v393_v46  ;;  %v516_v34 = vmul.f32 %v1482_v57, %v1640_v36 }
  0xe6   : > { %v1125_v6 = vmul.f32 -1.442695, %v1698_v30  ;;  %v1129_v37 = vmul.f32 -1.442695, %v1701_v55  ;;  %v517_v4 = vmul.f32 %v1490_v3, %v403_v29  ;;  %959 = vst [vmem:[%s1576_s13 + $0x48] sm:$0xff] %v943_v58  ;;  %vm790_vm1 = vweird.f32 %v1245_v20 }
  0xe7   : > { %v732_v47 = vsel %vm731_vm0, %v1243_v10, %v728_v31  ;;  %v787_v38 = vmul.f32 %v1245_v20, %v786_v32  ;;  %v1714_v54 = vadd.f32 %v1649_v48, %v513_v33  ;;  %v1247_v28 = vpop.eup %1246  ;;  %v1720_v36 = vadd.f32 %v607_v11, %v516_v34  ;;  %vm791_vm2 = vmor %vm789_vm13, %vm790_vm1 }
  0xe8   : > { %v737_v17 = vsel %vm1675_vm12, %v736_v14, %v732_v47  ;;  %1250 = vpow2.f32 %v1125_v6  ;;  %v1718_v57 = vadd.f32 %v612_v23, %v517_v4  ;;  %v688_v43 = vadd.f32 1.0, %v1247_v28 }
  0xe9   : > { %v936_v41 = vmul.f32 %v737_v17, %v1529_v61  ;;  %v788_v3 = vadd.f32 %v1245_v20, %v787_v38  ;;  %1252 = vpow2.f32 %v1129_v37  ;;  %v796_v45 = vor.u32 1.1754944e-38, %v795_v52 }
  0xea   : > { %v1249_v44 = vpop.eup %1248  ;;  %v1133_v48 = vmul.f32 -1.442695, %v1714_v54  ;;  %v1137_v49 = vmul.f32 -1.442695, %v1718_v57  ;;  %vm794_vm3 = vcmp.eq.f32.partialorder %v793_v0, 8.507059e+37  ;;  %1254 = vrcp.f32 %v688_v43 }
  0xeb   : > { %952 = vst [vmem:[%s1576_s13 + $0x10] sm:$0xff] %v936_v41  ;;  %v792_v27 = vsel %vm791_vm2, %v1245_v20, %v788_v3  ;;  %v1728_v51 = vadd.f32 1.0, %v1249_v44  ;;  %v1136_v61 = vmul.f32 -1.442695, %v1720_v36  ;;  %v853_v10 = vand.u32 2147483647, %v688_v43 }
  0xec   : > { %v797_v50 = vsel %vm794_vm3, %v796_v45, %v792_v27  ;;  %1256 = vpow2.f32 %v1133_v48  ;;  %v855_v35 = vand.u32 2147483648, %v688_v43  ;;  %vm849_vm4 = vweird.f32 %v688_v43 }
  0xed   : > { %v940_v53 = vmul.f32 %v797_v50, %v1545_v12  ;;  %1258 = vpow2.f32 %v1137_v49  ;;  %v883_v25 = vand.u32 2147483647, %v1728_v51  ;;  %vm1741_vm5 = vcmp.eq.f32.partialorder %v853_v10, 8.507059e+37 }
  0xee   : > { %v1251_v39 = vpop.eup %1250  ;;  %1260 = vrcp.f32 %v1728_v51  ;;  %v856_v9 = vor.u32 1.1754944e-38, %v855_v35  ;;  %vm879_vm6 = vweird.f32 %v1728_v51  ;;  %v885_v5 = vand.u32 2147483648, %v1728_v51 }
  0xef   : > { %v1253_v56 = vpop.eup %1252  ;;  %956 = vst [vmem:[%s1576_s13 + $0x30] sm:$0xff] %v940_v53  ;;  %v1734_v60 = vadd.f32 1.0, %v1251_v39  ;;  %1262 = vpow2.f32 %v1136_v61  ;;  %vm1753_vm8 = vcmp.eq.f32.partialorder %v883_v25, 8.507059e+37 }
  0xf0   : > { %v1736_v63 = vadd.f32 1.0, %v1253_v56  ;;  %v1255_v59 = vpop.eup %1254  ;;  %v886_v26 = vor.u32 1.1754944e-38, %v885_v5 }
  0xf1   : > { %1264 = vrcp.f32 %v1734_v60  ;;  %v845_v12 = vmul.f32 %v1255_v59, %v688_v43  ;;  %v748_v0 = vand.u32 2147483647, %v1734_v60  ;;  %vm850_vm7 = vweird.f32 %v1255_v59 }
  0xf2   : > { %v1257_v7 = vpop.eup %1256  ;;  %1266 = vrcp.f32 %v1736_v63  ;;  %v750_v20 = vand.u32 2147483648, %v1734_v60  ;;  %v808_v19 = vand.u32 2147483647, %v1736_v63  ;;  %v810_v46 = vand.u32 2147483648, %v1736_v63  ;;  %vm851_vm12 = vmor %vm849_vm4, %vm850_vm7 }
  0xf3   : > { %v1259_v8 = vpop.eup %1258  ;;  %v846_v14 = vsub.f32 1.0, %v845_v12  ;;  %v1748_v15 = vadd.f32 1.0, %v1257_v7  ;;  %vm744_vm9 = vweird.f32 %v1734_v60  ;;  %vm1764_vm10 = vcmp.eq.f32.partialorder %v748_v0, 8.507059e+37 }
  0xf4   : > { %v1261_v2 = vpop.eup %1260  ;;  %v1750_v16 = vadd.f32 1.0, %v1259_v8  ;;  %vm804_vm11 = vweird.f32 %v1736_v63  ;;  %v751_v33 = vor.u32 1.1754944e-38, %v750_v20  ;;  %vm1772_vm14 = vcmp.eq.f32.partialorder %v808_v19, 8.507059e+37 }
  0xf5   : > { %v875_v18 = vmul.f32 %v1261_v2, %v1728_v51  ;;  %v1263_v40 = vpop.eup %1262  ;;  %v847_v21 = vmul.f32 %v1255_v59, %v846_v14  ;;  %1268 = vrcp.f32 %v1748_v15  ;;  %vm880_vm13 = vweird.f32 %v1261_v2 }
  0xf6   : > { %1270 = vrcp.f32 %v1750_v16  ;;  %v811_v37 = vor.u32 1.1754944e-38, %v810_v46  ;;  %v1778_v28 = vadd.f32 1.0, %v1263_v40  ;;  %vm881_vm15 = vmor %vm879_vm6, %vm880_vm13  ;;  %v868_v43 = vand.u32 2147483647, %v1748_v15 }
  0xf7   : > { %v1265_v22 = vpop.eup %1264  ;;  %v876_v24 = vsub.f32 1.0, %v875_v18  ;;  %v848_v1 = vadd.f32 %v1255_v59, %v847_v21  ;;  %v928_v35 = vand.u32 2147483647, %v1750_v16  ;;  %vm864_vm6 = vweird.f32 %v1748_v15 }
  0xf8   : > { %v1267_v29 = vpop.eup %1266  ;;  %v740_v58 = vmul.f32 %v1265_v22, %v1734_v60  ;;  %vm745_vm0 = vweird.f32 %v1265_v22  ;;  %1272 = vrcp.f32 %v1778_v28  ;;  %v913_v19 = vand.u32 2147483647, %v1778_v28 }
  0xf9   : > { %v877_v32 = vmul.f32 %v1261_v2, %v876_v24  ;;  %v800_v23 = vmul.f32 %v1267_v29, %v1736_v63  ;;  %v852_v11 = vsel %vm851_vm12, %v1255_v59, %v848_v1  ;;  %vm805_vm1 = vweird.f32 %v1267_v29  ;;  %vm746_vm2 = vmor %vm744_vm9, %vm745_vm0 }
  0xfa   : > { %v741_v34 = vsub.f32 1.0, %v740_v58  ;;  %v857_v4 = vsel %vm1741_vm5, %v856_v9, %v852_v11  ;;  %vm806_vm3 = vmor %vm804_vm11, %vm805_vm1  ;;  %v930_v59 = vand.u32 2147483648, %v1750_v16  ;;  %vm869_vm9 = vcmp.eq.f32.partialorder %v868_v43, 8.507059e+37 }
  0xfb   : > { %v878_v47 = vadd.f32 %v1261_v2, %v877_v32  ;;  %v801_v38 = vsub.f32 1.0, %v800_v23  ;;  %v1269_v17 = vpop.eup %1268  ;;  %v944_v41 = vmul.f32 %v857_v4, %v1611_v13  ;;  %v870_v13 = vand.u32 2147483648, %v1748_v15 }
  0xfc   : > { %v742_v3 = vmul.f32 %v1265_v22, %v741_v34  ;;  %v1271_v44 = vpop.eup %1270  ;;  %v860_v49 = vmul.f32 %v1269_v17, %v1748_v15  ;;  %vm865_vm4 = vweird.f32 %v1269_v17  ;;  %v931_v14 = vor.u32 1.1754944e-38, %v930_v59 }
  0xfd   : > { %v882_v45 = vsel %vm881_vm15, %v1261_v2, %v878_v47  ;;  %v802_v48 = vmul.f32 %v1267_v29, %v801_v38  ;;  %960 = vst [vmem:[%s1576_s13 + $0x50] sm:$0xff] %v944_v41  ;;  %v920_v51 = vmul.f32 %v1271_v44, %v1750_v16  ;;  %vm925_vm5 = vweird.f32 %v1271_v44  ;;  %vm866_vm7 = vmor %vm864_vm6, %vm865_vm4 }
  0xfe   : > { %v887_v27 = vsel %vm1753_vm8, %v886_v26, %v882_v45  ;;  %v743_v50 = vadd.f32 %v1265_v22, %v742_v3  ;;  %v861_v39 = vsub.f32 1.0, %v860_v49  ;;  %v871_v9 = vor.u32 1.1754944e-38, %v870_v13  ;;  %v1273_v2 = vpop.eup %1272 }
  0xff   : > { %v946_v61 = vmul.f32 %v887_v27, %v1670_v62  ;;  %v803_v53 = vadd.f32 %v1267_v29, %v802_v48  ;;  %v921_v10 = vsub.f32 1.0, %v920_v51  ;;  %vm924_vm8 = vweird.f32 %v1750_v16 }
 0x100   : > { %v747_v56 = vsel %vm746_vm2, %v1265_v22, %v743_v50  ;;  %v862_v25 = vmul.f32 %v1269_v17, %v861_v39  ;;  %vm929_vm11 = vcmp.eq.f32.partialorder %v928_v35, 8.507059e+37  ;;  %v915_v16 = vand.u32 2147483648, %v1778_v28 }
 0x101   : > { %962 = vst [vmem:[%s1576_s13 + $0x60] sm:$0xff] %v946_v61  ;;  %v752_v62 = vsel %vm1764_vm10, %v751_v33, %v747_v56  ;;  %v807_v60 = vsel %vm806_vm3, %v1267_v29, %v803_v53  ;;  %v922_v12 = vmul.f32 %v1271_v44, %v921_v10  ;;  %vm926_vm10 = vmor %vm924_vm8, %vm925_vm5  ;;  %vm910_vm12 = vweird.f32 %v1273_v2 }
 0x102   : > { %v937_v7 = vmul.f32 %v752_v62, %v1698_v30  ;;  %v812_v63 = vsel %vm1772_vm14, %v811_v37, %v807_v60  ;;  %v863_v42 = vadd.f32 %v1269_v17, %v862_v25  ;;  %vm909_vm13 = vweird.f32 %v1778_v28 }
 0x103   : > { %v941_v8 = vmul.f32 %v812_v63, %v1701_v55  ;;  %v923_v5 = vadd.f32 %v1271_v44, %v922_v12  ;;  %v905_v55 = vmul.f32 %v1273_v2, %v1778_v28  ;;  %vm911_vm14 = vmor %vm909_vm13, %vm910_vm12  ;;  %v916_v22 = vor.u32 1.1754944e-38, %v915_v16 }
 0x104   : > { %953 = vst [vmem:[%s1576_s13 + $0x18] sm:$0xff] %v937_v7  ;;  %v867_v30 = vsel %vm866_vm7, %v1269_v17, %v863_v42  ;;  %vm914_vm15 = vcmp.eq.f32.partialorder %v913_v19, 8.507059e+37 }
 0x105   : > { %957 = vst [vmem:[%s1576_s13 + $0x38] sm:$0xff] %v941_v8  ;;  %v872_v0 = vsel %vm869_vm9, %v871_v9, %v867_v30  ;;  %v927_v18 = vsel %vm926_vm10, %v1271_v44, %v923_v5  ;;  %v906_v40 = vsub.f32 1.0, %v905_v55 }
 0x106   : > { %v945_v15 = vmul.f32 %v872_v0, %v1714_v54  ;;  %v932_v52 = vsel %vm929_vm11, %v931_v14, %v927_v18 }
 0x107   : > { %v949_v20 = vmul.f32 %v932_v52, %v1718_v57  ;;  %v907_v21 = vmul.f32 %v1273_v2, %v906_v40 }
 0x108   : > { %961 = vst [vmem:[%s1576_s13 + $0x58] sm:$0xff] %v945_v15 }
 0x109   : > { %965 = vst [vmem:[%s1576_s13 + $0x78] sm:$0xff] %v949_v20  ;;  %v908_v46 = vadd.f32 %v1273_v2, %v907_v21 }
 0x10b   : > { %v912_v24 = vsel %vm911_vm14, %v1273_v2, %v908_v46 }
 0x10c   : > { %v917_v54 = vsel %vm914_vm15, %v916_v22, %v912_v24 }
 0x10d   : > { %v948_v57 = vmul.f32 %v917_v54, %v1720_v36 }
 0x10f   : > { %964 = vst [vmem:[%s1576_s13 + $0x70] sm:$0xff] %v948_v57 }
 0x110 PF: > { %s14_s17 = sadd.s32 1, %s1296_s17   ;;  %s1857_s15 = smov %s1292_s16 }
 0x111   : > { %p11_p5 = scmp.ge.s32.totalorder %s14_s17, 4   ;;  %s1858_s16 = smov %s1860_s18 }
 0x113   :  { %13 = sbr.rel (!%p11_p5) target bundleno = 2 (0x2), region = 66 }

</bundles_post_ra>
